<compile_context>
chip_gen: v7x
topology: tpu7x:2x2x1
jax: 0.10.0
libtpu: 0.0.40
codegen_flags: <defaults>
</compile_context>

<pallas_src>
import functools
import math

import jax
import jax.numpy as jnp
import numpy as np
from jax.experimental import pallas as pl
from jax.experimental.pallas import tpu as pltpu

NOISE_SCALE = 5000


def _silu(v):
    return v * jax.nn.sigmoid(v)


# ----------------------------------------------------------------------------
# Kernel
# ----------------------------------------------------------------------------
def dense_film_kernel(t_ref, freq_ref, w1_ref, b1_ref, w2_ref, b2_ref,
                      wss_ref, bss_ref, out_ref):
    # ContinousNoiseSchedual, in-kernel: [B,1] x [1,half] -> [B,half] -> [B,E]
    expo = (NOISE_SCALE * t_ref[...]) * freq_ref[...]
    emb = jnp.concatenate([jnp.sin(expo), jnp.cos(expo)], axis=-1)  # f32 [B, E]

    # branch[0]: Linear(E, 4E) + SiLU  (bf16 MXU operands, f32 accumulation)
    h = jnp.dot(emb.astype(jnp.bfloat16), w1_ref[...],
                preferred_element_type=jnp.float32) + b1_ref[...]
    h = _silu(h)                                                    # f32 VPU/EUP

    # branch[2]: Linear(4E, 4E)
    h = jnp.dot(h.astype(jnp.bfloat16), w2_ref[...],
                preferred_element_type=jnp.float32) + b2_ref[...]

    # Fused scale|shift heads: one lane-dense [4E, 2*out_dim] matmul, one
    # wide unmasked store stream; split happens in the wrapper.
    ss = jnp.dot(h.astype(jnp.bfloat16), wss_ref[...],
                 preferred_element_type=jnp.float32) + bss_ref[...]
    out_ref[...] = ss.astype(out_ref.dtype)


# ----------------------------------------------------------------------------
# Wrapper
# ----------------------------------------------------------------------------
@functools.partial(jax.jit, static_argnames=("sequence",))
def dense_film(t, packed, *, sequence=True):
    """t: [B, 1, 1]. Returns (scale, shift): [B, 1, out_dim] if sequence else [B, out_dim]."""
    B = t.shape[0]
    E, hid = packed["w1"].shape
    two_out = packed["bss"].shape[-1]
    out_dim = two_out // 2
    half = packed["freq"].shape[-1]

    t2 = t.reshape(B, 1).astype(jnp.float32)

    cost = pl.CostEstimate(
        flops=2 * B * (E * hid + hid * hid + hid * two_out),
        transcendentals=B * (2 * half + hid),           # sin/cos + sigmoid exp
        bytes_accessed=(4 * (B + half)                  # t, freq
                        + 2 * (E * hid + hid * hid + hid * two_out)  # bf16 weights
                        + 4 * (hid + hid + two_out)     # f32 biases
                        + 4 * B * two_out),             # f32 output
    )

    vmem = pl.BlockSpec(memory_space=pltpu.MemorySpace.VMEM)
    ss = pl.pallas_call(
        dense_film_kernel,
        out_shape=jax.ShapeDtypeStruct((B, two_out), jnp.float32),
        in_specs=[vmem] * 8,
        out_specs=vmem,
        cost_estimate=cost,
    )(t2, packed["freq"], packed["w1"], packed["b1"],
      packed["w2"], packed["b2"], packed["wss"], packed["bss"])

    scale = ss[:, :out_dim]
    shift = ss[:, out_dim:]
    if sequence:
        scale = scale[:, None, :]
        shift = shift[:, None, :]
    return scale, shift


# ----------------------------------------------------------------------------
# Parameter init / one-time packing / pure-JAX reference
# ----------------------------------------------------------------------------
def init_params(key, emb_dim, out_dim):
    """Deterministic init mirroring nn.Linear / ContinousNoiseSchedual buffers."""
    half = emb_dim // 2
    denom = float(max(half - 1, 1))                    # guard against emb_dim == 2
    freq = jnp.exp(jnp.arange(half, dtype=jnp.float32) * -(math.log(10000.0) / denom))
    hid = 4 * emb_dim
    ks = jax.random.split(key, 8)

    def linear(kw, kb, fan_in, fan_out):
        lim = 1.0 / math.sqrt(fan_in)
        # PyTorch Linear stores weight as [out, in]; pre-transposed to [in, out].
        w = jax.random.uniform(kw, (fan_in, fan_out), jnp.float32, -lim, lim)
        b = jax.random.uniform(kb, (1, fan_out), jnp.float32, -lim, lim)
        return w, b

    w1, b1 = linear(ks[0], ks[1], emb_dim, hid)
    w2, b2 = linear(ks[2], ks[3], hid, hid)
    ws, bs = linear(ks[4], ks[5], hid, out_dim)
    wsh, bsh = linear(ks[6], ks[7], hid, out_dim)
    return dict(freq=freq, w1=w1, b1=b1, w2=w2, b2=b2,
                w_scale=ws, b_scale=bs, w_shift=wsh, b_shift=bsh)


def pack_params(params):
    """One-time packing: bf16 MXU weights, fused scale|shift projection, 2-D freq."""
    return dict(
        freq=params["freq"].reshape(1, -1).astype(jnp.float32),
        w1=params["w1"].astype(jnp.bfloat16),
        b1=params["b1"].astype(jnp.float32),
        w2=params["w2"].astype(jnp.bfloat16),
        b2=params["b2"].astype(jnp.float32),
        wss=jnp.concatenate([params["w_scale"], params["w_shift"]],
                            axis=1).astype(jnp.bfloat16),
        bss=jnp.concatenate([params["b_scale"], params["b_shift"]],
                            axis=1).astype(jnp.float32),
    )


def reference(t, params, *, sequence=True):
    """Pure-JAX f32 reference replicating the PyTorch forward exactly."""
    noise = t.reshape(t.shape[0])
    expo = NOISE_SCALE * noise[:, None] * params["freq"][None, :]
    emb = jnp.concatenate([jnp.sin(expo), jnp.cos(expo)], axis=-1)
    h = emb @ params["w1"] + params["b1"]
    h = _silu(h)
    h = h @ params["w2"] + params["b2"]
    scale = h @ params["w_scale"] + params["b_scale"]
    shift = h @ params["w_shift"] + params["b_shift"]
    if sequence:
        scale = scale[:, None, :]
        shift = shift[:, None, :]
    return scale, shift


if __name__ == "__main__":
    B, emb_dim, out_dim = 8, 64, 128      # branch hidden = 4*emb_dim = 256

    key = jax.random.PRNGKey(0)
    kt, kp = jax.random.split(key)
    t = jax.random.uniform(kt, (B, 1, 1), jnp.float32)   # diffusion time in [0, 1)
    params = init_params(kp, emb_dim, out_dim)
    packed = jax.tree_util.tree_map(jax.block_until_ready, pack_params(params))

    scale, shift = dense_film(t, packed, sequence=True)
    scale = jax.block_until_ready(scale)
    shift = jax.block_until_ready(shift)

    scale_ref, shift_ref = reference(t, params, sequence=True)
    # bf16 MXU operands (f32 accumulation) vs full-f32 reference -> modest tolerance.
    np.testing.assert_allclose(np.asarray(scale), np.asarray(scale_ref),
                               rtol=5e-2, atol=2e-2)
    np.testing.assert_allclose(np.asarray(shift), np.asarray(shift_ref),
                               rtol=5e-2, atol=2e-2)

    print("KERNEL_OK")
</pallas_src>

<mosaic_0001>
module attributes {stable_mosaic.version = 11 : i64} {
  func.func @dense_film_kernel(%arg0: memref<8x1xf32, #tpu.memory_space<vmem>>, %arg1: memref<1x32xf32, #tpu.memory_space<vmem>>, %arg2: memref<64x256xbf16, #tpu.memory_space<vmem>>, %arg3: memref<1x256xf32, #tpu.memory_space<vmem>>, %arg4: memref<256x256xbf16, #tpu.memory_space<vmem>>, %arg5: memref<1x256xf32, #tpu.memory_space<vmem>>, %arg6: memref<256x256xbf16, #tpu.memory_space<vmem>>, %arg7: memref<1x256xf32, #tpu.memory_space<vmem>>, %arg8: memref<8x256xf32, #tpu.memory_space<vmem>>) attributes {dimension_semantics = [], scalar_prefetch = 0 : i64, scratch_operands = 0 : i64, tpu.core_type = #tpu.core_type<tc>} {
    %c0 = arith.constant 0 : index
    %c0_0 = arith.constant 0 : index
    %0 = vector.load %arg0[%c0, %c0_0] : memref<8x1xf32, #tpu.memory_space<vmem>>, vector<8x1xf32>
    %cst = arith.constant 5.000000e+03 : f32
    %1 = vector.broadcast %cst : f32 to vector<8x1xf32>
    %2 = arith.mulf %1, %0 : vector<8x1xf32>
    %c0_1 = arith.constant 0 : index
    %c0_2 = arith.constant 0 : index
    %3 = vector.load %arg1[%c0_1, %c0_2] : memref<1x32xf32, #tpu.memory_space<vmem>>, vector<1x32xf32>
    %4 = vector.broadcast %2 : vector<8x1xf32> to vector<8x32xf32>
    %5 = vector.broadcast %3 : vector<1x32xf32> to vector<8x32xf32>
    %6 = arith.mulf %4, %5 : vector<8x32xf32>
    %7 = math.sin %6 : vector<8x32xf32>
    %8 = math.cos %6 : vector<8x32xf32>
    %9 = tpu.concatenate %7, %8 in 1 : vector<8x32xf32>, vector<8x32xf32> -> vector<8x64xf32>
    %10 = arith.truncf %9 : vector<8x64xf32> to vector<8x64xbf16>
    %c0_3 = arith.constant 0 : index
    %c0_4 = arith.constant 0 : index
    %11 = vector.load %arg2[%c0_3, %c0_4] : memref<64x256xbf16, #tpu.memory_space<vmem>>, vector<64x256xbf16>
    %cst_5 = arith.constant dense<0.000000e+00> : vector<8x256xf32>
    %12 = tpu.matmul %10, %11, %cst_5 {dimension_numbers = #tpu.dot_dimension_numbers<[1], [0], [0], [1], [0, 0, 1, 1], [], []>} : vector<8x64xbf16>, vector<64x256xbf16>, vector<8x256xf32> -> vector<8x256xf32>
    %c0_6 = arith.constant 0 : index
    %c0_7 = arith.constant 0 : index
    %13 = vector.load %arg3[%c0_6, %c0_7] : memref<1x256xf32, #tpu.memory_space<vmem>>, vector<1x256xf32>
    %14 = vector.broadcast %13 : vector<1x256xf32> to vector<8x256xf32>
    %15 = arith.addf %12, %14 : vector<8x256xf32>
    %16 = arith.negf %15 : vector<8x256xf32>
    %17 = math.exp %16 : vector<8x256xf32>
    %cst_8 = arith.constant 1.000000e+00 : f32
    %18 = vector.broadcast %cst_8 : f32 to vector<8x256xf32>
    %19 = arith.addf %18, %17 : vector<8x256xf32>
    %20 = arith.divf %18, %19 : vector<8x256xf32>
    %21 = arith.mulf %15, %20 : vector<8x256xf32>
    %22 = arith.truncf %21 : vector<8x256xf32> to vector<8x256xbf16>
    %c0_9 = arith.constant 0 : index
    %c0_10 = arith.constant 0 : index
    %23 = vector.load %arg4[%c0_9, %c0_10] : memref<256x256xbf16, #tpu.memory_space<vmem>>, vector<256x256xbf16>
    %cst_11 = arith.constant dense<0.000000e+00> : vector<8x256xf32>
    %24 = tpu.matmul %22, %23, %cst_11 {dimension_numbers = #tpu.dot_dimension_numbers<[1], [0], [0], [1], [0, 0, 1, 1], [], []>} : vector<8x256xbf16>, vector<256x256xbf16>, vector<8x256xf32> -> vector<8x256xf32>
    %c0_12 = arith.constant 0 : index
    %c0_13 = arith.constant 0 : index
    %25 = vector.load %arg5[%c0_12, %c0_13] : memref<1x256xf32, #tpu.memory_space<vmem>>, vector<1x256xf32>
    %26 = vector.broadcast %25 : vector<1x256xf32> to vector<8x256xf32>
    %27 = arith.addf %24, %26 : vector<8x256xf32>
    %28 = arith.truncf %27 : vector<8x256xf32> to vector<8x256xbf16>
    %c0_14 = arith.constant 0 : index
    %c0_15 = arith.constant 0 : index
    %29 = vector.load %arg6[%c0_14, %c0_15] : memref<256x256xbf16, #tpu.memory_space<vmem>>, vector<256x256xbf16>
    %cst_16 = arith.constant dense<0.000000e+00> : vector<8x256xf32>
    %30 = tpu.matmul %28, %29, %cst_16 {dimension_numbers = #tpu.dot_dimension_numbers<[1], [0], [0], [1], [0, 0, 1, 1], [], []>} : vector<8x256xbf16>, vector<256x256xbf16>, vector<8x256xf32> -> vector<8x256xf32>
    %c0_17 = arith.constant 0 : index
    %c0_18 = arith.constant 0 : index
    %31 = vector.load %arg7[%c0_17, %c0_18] : memref<1x256xf32, #tpu.memory_space<vmem>>, vector<1x256xf32>
    %32 = vector.broadcast %31 : vector<1x256xf32> to vector<8x256xf32>
    %33 = arith.addf %30, %32 : vector<8x256xf32>
    %c0_19 = arith.constant 0 : index
    %c0_20 = arith.constant 0 : index
    %34 = vector.load %arg8[%c0_19, %c0_20] : memref<8x256xf32, #tpu.memory_space<vmem>>, vector<8x256xf32>
    tpu.vector_store %arg8[%c0_19, %c0_20], %33 {strides = array<i32>} : memref<8x256xf32, #tpu.memory_space<vmem>>, vector<8x256xf32>,
    return
  }
}

</mosaic_0001>

<bundles_post_ra>
// kernel: dense_film.1
= control target key start
LH: loop header
LB: loop body
LE: loop exit
PB: predicated region body
PF: predicated region fallthrough
CT: control target
= control target key end

     0   :  { %13 = vsyncpa [#allocation3], 0  ;;  %s1365_s0 = inlined_call_operand.vmem [shape: f32[8,1], index: 0, kind: input, shape index: {}]   ;;  %s1366_s1 = inlined_call_operand.vmem [shape: f32[1,32], index: 1, kind: input, shape index: {}]   ;;  %s1367_s2 = inlined_call_operand.hbm [shape: bf16[64,256], index: 2, kind: input, shape index: {}]   ;;  %s1368_s3 = inlined_call_operand.vmem [shape: f32[1,256], index: 3, kind: input, shape index: {}]   ;;  %s1369_s4 = inlined_call_operand.hbm [shape: bf16[256,256], index: 4, kind: input, shape index: {}]   ;;  %s1370_s5 = inlined_call_operand.vmem [shape: f32[1,256], index: 5, kind: input, shape index: {}]   ;;  %s1371_s6 = inlined_call_operand.hbm [shape: bf16[256,256], index: 6, kind: input, shape index: {}]   ;;  %s1372_s7 = inlined_call_operand.vmem [shape: f32[1,256], index: 7, kind: input, shape index: {}]   ;;  %s1373_s8 = inlined_call_operand.vmem [shape: f32[8,256], index: 8, kind: output, shape index: {}]  }
   0x1   :  { %14 = vsyncpa [#allocation5], 0  ;;  %s1213_s27 = smov [#allocation4]   ;;  %s1214_s29 = smov [#allocation2]  }
   0x2   :  { %s38_s28 = sshll.u32 %s1213_s27, 4  ;;  %s24_s30 = sshll.u32 %s1214_s29, 4  ;;  %s39_s28 = int_to_ptr.vmem [resolvable:$true] %s38_s28  ;;  %s1271_s30 = int_to_ptr.vmem [resolvable:$true] %s24_s30 }
   0x3   :  { %s1143_s11 = scalar_lea.hbm %s1369_s4, 4096 }
   0x4   :  { %p1144_p0 = scmp.ne.s32.totalorder %s1369_s4, %s1143_s11  ;;  %p1147_p1 = scmp.lt.u32.totalorder %s1143_s11, %s1369_s4 }
   0x6   :  { %p1149_p2 = pnand %p1147_p1, %p1144_p0 }
   0x8   :  { %1152 = shalt.err (!%p1149_p2)
}
   0x9   :  { %s1153_s16 = scalar_lea.vmem %s39_s28, 4096  ;;  %p1158_p4 = scmp.lt.s32.totalorder %s39_s28, %s39_s28 }
   0xa   :  { %p1154_p3 = scmp.ne.s32.totalorder %s39_s28, %s1153_s16  ;;  %p1159_p5 = scmp.lt.s32.totalorder %s1153_s16, %s1153_s16 }
   0xc   :  { %p1160_p6 = por %p1159_p5, %p1158_p4 }
   0xe   :  { %p1161_p7 = pnand %p1160_p6, %p1154_p3 }
  0x10   :  { %1164 = shalt.err (!%p1161_p7)
}
  0x11   :  { %s1215_s17 = smov 128   ;;  %s1216_s18 = smov 8  }
  0x12   :  { %44 = dma.hbm_to_vmem [thread:$0]  %s1369_s4, 4096, %s39_s28, [#allocation5], %s1215_s17, %s1215_s17, %s1216_s18  }
  0x13   :  { %s1165_s23 = scalar_lea.hbm %s1367_s2, 1024 }
  0x14   :  { %p1166_p8 = scmp.ne.s32.totalorder %s1367_s2, %s1165_s23  ;;  %p1169_p9 = scmp.lt.u32.totalorder %s1165_s23, %s1367_s2 }
  0x16   :  { %p1171_p10 = pnand %p1169_p9, %p1166_p8 }
  0x18   :  { %1174 = shalt.err (!%p1171_p10)
}
  0x19   :  { %s1175_s29 = scalar_lea.vmem %s1271_s30, 1024  ;;  %p1180_p12 = scmp.lt.s32.totalorder %s1271_s30, %s1271_s30 }
  0x1a   :  { %p1176_p11 = scmp.ne.s32.totalorder %s1271_s30, %s1175_s29  ;;  %p1181_p13 = scmp.lt.s32.totalorder %s1175_s29, %s1175_s29 }
  0x1c   :  { %p1182_p0 = por %p1181_p13, %p1180_p12 }
  0x1e   :  { %p1183_p1 = pnand %p1182_p0, %p1176_p11 }
  0x20   :  { %1186 = shalt.err (!%p1183_p1)
}
  0x21   :  { %30 = dma.hbm_to_vmem [thread:$0]  %s1367_s2, 1024, %s1271_s30, [#allocation3], %s1215_s17, %s1215_s17, %s1216_s18  }
  0x22   :  { %s1217_s9 = smov [#allocation6]   ;;  %s1187_s13 = scalar_lea.hbm %s1371_s6, 4096 }
  0x23   :  { %s52_s10 = sshll.u32 %s1217_s9, 4  ;;  %p1188_p2 = scmp.ne.s32.totalorder %s1371_s6, %s1187_s13  ;;  %s53_s10 = int_to_ptr.vmem [resolvable:$true] %s52_s10 }
  0x24   :  { %p1191_p3 = scmp.lt.u32.totalorder %s1187_s13, %s1371_s6 }
  0x26   :  { %p1193_p4 = pnand %p1191_p3, %p1188_p2 }
  0x28   :  { %1196 = shalt.err (!%p1193_p4)
}
  0x29   :  { %s1197_s20 = scalar_lea.vmem %s53_s10, 4096  ;;  %p1202_p6 = scmp.lt.s32.totalorder %s53_s10, %s53_s10 }
  0x2a   :  { %p1198_p5 = scmp.ne.s32.totalorder %s53_s10, %s1197_s20  ;;  %p1203_p7 = scmp.lt.s32.totalorder %s1197_s20, %s1197_s20 }
  0x2c   :  { %p1204_p8 = por %p1203_p7, %p1202_p6 }
  0x2e   :  { %p1205_p9 = pnand %p1204_p8, %p1198_p5 }
  0x30   :  { %1208 = shalt.err (!%p1205_p9)
}
  0x31   :  { %58 = dma.hbm_to_vmem [thread:$0]  %s1371_s6, 4096, %s53_s10, [#allocation5], %s1215_s17, %s1215_s17, %s1216_s18  }
  0x32   :  { %1209 = dma.done.wait [#allocation3], 1024  }
  0x33   :  { %1210 = vsyncadd [#allocation3], 4294966272 }
  0x34   :  { %1211 = dma.done.wait [#allocation5], 8192  }
  0x35   :  { %1212 = vsyncadd [#allocation5], 4294959104  ;;  %v1218_v0 = vmov 0   ;;  %v71_v1 = vld [vmem:[%s1365_s0] sm:$0xff]  ;;  %v1026_v5 = vld [vmem:[#allocation2 + $0x14] ss:$8 sps:$4 sm:$0xff]  }
  0x36   :  { %1022 = vset.pattern.permute.xlu0 %v1218_v0  ;;  %396 = vmatprep.mubr.bf16.mxu0 %v1218_v0  ;;  %v72_v2 = vmul.f32 5000.0, %v71_v1  ;;  %v1023_v3 = vld [vmem:[#allocation2 + $0x4] ss:$8 sps:$4 sm:$0xff]   ;;  %v1025_v4 = vld [vmem:[#allocation2] ss:$8 sps:$4 sm:$0xff]   ;;  %s1225_s0 = smov 32  }
  0x37   :  { %364 = vmatprep.subr.bf16.mxu0 %v1023_v3  ;;  %v1028_v6 = vld [vmem:[#allocation2 + $0x10] ss:$8 sps:$4 sm:$0xff]   ;;  %v1029_v7 = vld [vmem:[#allocation2 + $0x24] ss:$8 sps:$4 sm:$0xff]   ;;  %v1031_v8 = vld [vmem:[#allocation2 + $0x20] ss:$8 sps:$4 sm:$0xff]  }
  0x38   :  { %76 = vperm.xlu0 %1022, %v72_v2   ;;  %365 = vmatpush1.bf16.msra.mxu0 %v1025_v4  ;;  %v1032_v9 = vld [vmem:[#allocation2 + $0x34] ss:$8 sps:$4 sm:$0xff]   ;;  %v921_v10 = vld [vmem:[%s1366_s1] ss:$0 sm:$0xff]  ;;  %v1219_v23 = vmov 683565275  }
  0x39   :  { %366 = vmatprep.subr.bf16.mxu0 %v1026_v5  ;;  %v1220_v25 = vmov 2475754826   ;;  %v1221_v28 = vmov 2131351028   ;;  %v1222_v31 = vmov 2102212464  }
  0x3a   :  { %v1223_v34 = vmov 920167782   ;;  %v1224_v37 = vmov 1326507024  }
  0x3c   :  { %367 = vmatpush1.bf16.msra.mxu0 %v1028_v6 }
  0x3d   :  { %368 = vmatprep.subr.bf16.mxu0 %v1029_v7 }
  0x40   :  { %369 = vmatpush1.bf16.msra.mxu0 %v1031_v8 }
  0x41   :  { %370 = vmatprep.subr.bf16.mxu0 %v1032_v9 }
  0xb7   :  { %v77_v11 = vpop.permute.xlu0 %76 }
  0xb8   :  { %v1329_v12 = vmul.f32 %v921_v10, %v77_v11 }
  0xba   :  { %v89_v13 = vand.u32 2139095040, %v1329_v12  ;;  %v86_v17 = vand.u32 2147483647, %v1329_v12  ;;  %vm88_vm7 = vcmp.lt.s32.totalorder %v1329_v12, 0  ;;  %vm178_vm15 = vweird.f32 %v1329_v12 }
  0xbc   :  { %v90_v14 = vshrl.u32 %v89_v13, 23  ;;  %v93_v20 = vand.u32 8388607, %v86_v17  ;;  %vm87_vm8 = vcmp.le.f32.partialorder %v86_v17, 0.7853982 }
  0xbe   :  { %v922_v15 = vadd.s32 4294967169, %v90_v14  ;;  %v94_v39 = vor.u32 8388608, %v93_v20 }
  0xc0   :  { %v96_v16 = vadd.s32 1, %v922_v15  ;;  %v134_v53 = vshll.u32 %v94_v39, 8 }
  0xc2   :  { %vm97_vm0 = vcmp.gt.s32.totalorder %v96_v16, 0 }
  0xc3   :  { %v98_v18 = vsel %vm97_vm0, %v96_v16, 0  ;;  %vm297_vm0 = vcmask 261120  }
  0xc4   :  { %v100_v19 = vand.u32 31, %v98_v18  ;;  %v99_v22 = vshrl.u32 %v98_v18, 5 }
  0xc6   :  { %v101_v21 = vsub.s32 32, %v100_v19  ;;  %v103_v24 = vshll.u32 %v1219_v23, %v100_v19  ;;  %v106_v26 = vshll.u32 %v1220_v25, %v100_v19  ;;  %v109_v30 = vshll.u32 %v1221_v28, %v100_v19 }
  0xc7   :  { %v112_v33 = vshll.u32 %v1222_v31, %v100_v19  ;;  %v115_v36 = vshll.u32 %v1223_v34, %v100_v19  ;;  %vm118_vm1 = vcmp.lt.s32.totalorder %v99_v22, 1  ;;  %vm121_vm2 = vcmp.lt.s32.totalorder %v99_v22, 4 }
  0xc8   :  { %v104_v27 = vshrl.u32 %v1220_v25, %v101_v21  ;;  %v107_v29 = vshrl.u32 %v1221_v28, %v101_v21  ;;  %v110_v32 = vshrl.u32 %v1222_v31, %v101_v21  ;;  %v113_v35 = vshrl.u32 %v1223_v34, %v101_v21  ;;  %v1035_v34 = vld [vmem:[#allocation4 + $0x4] ss:$8 sps:$4 sm:$0xff]  }
  0xc9   :  { %v116_v38 = vshrl.u32 %v1224_v37, %v101_v21  ;;  %v102_v48 = vshrl.u32 %v1219_v23, %v101_v21  ;;  %vm120_vm3 = vcmp.lt.s32.totalorder %v99_v22, 3  ;;  %vm119_vm4 = vcmp.lt.s32.totalorder %v99_v22, 2  ;;  %625 = vmatprep.subr.bf16.mxu1 %v1035_v34  ;;  %v1104_v34 = vld [vmem:[#allocation6 + $0x70] ss:$8 sps:$4 sm:$0xff]  }
  0xca   :  { %v105_v40 = vor.u32 %v104_v27, %v103_v24  ;;  %v108_v41 = vor.u32 %v107_v29, %v106_v26  ;;  %v111_v42 = vor.u32 %v110_v32, %v109_v30  ;;  %v114_v43 = vor.u32 %v113_v35, %v112_v33  ;;  %v1034_v32 = vld [vmem:[#allocation2 + $0x30] ss:$8 sps:$4 sm:$0xff]   ;;  %v1037_v35 = vld [vmem:[#allocation4] ss:$8 sps:$4 sm:$0xff]  }
  0xcb   :  { %v117_v44 = vor.u32 %v116_v38, %v115_v36  ;;  %371 = vmatpush1.bf16.msra.mxu0 %v1034_v32  ;;  %v1038_v36 = vld [vmem:[#allocation4 + $0x14] ss:$8 sps:$4 sm:$0xff]   ;;  %626 = vmatpush1.bf16.msra.mxu1 %v1037_v35  ;;  %v1101_v32 = vld [vmem:[#allocation6 + $0x60] ss:$8 sps:$4 sm:$0xff]   ;;  %v1109_v35 = vld [vmem:[#allocation6 + $0x84] ss:$8 sps:$4 sm:$0xff]  }
  0xcc   :  { %v123_v45 = vsel %vm121_vm2, %v111_v42, 2102212464  ;;  %v126_v46 = vsel %vm118_vm1, %v105_v40, %v108_v41  ;;  %v130_v47 = vsel %vm118_vm1, %v108_v41, %v111_v42  ;;  %v127_v49 = vsel %vm121_vm2, %v114_v43, 920167782  ;;  %627 = vmatprep.subr.bf16.mxu1 %v1038_v36  ;;  %v1107_v36 = vld [vmem:[#allocation6 + $0x80] ss:$8 sps:$4 sm:$0xff]  }
  0xcd   :  { %v131_v50 = vsel %vm121_vm2, %v117_v44, 1326507024  ;;  %v128_v51 = vsel %vm120_vm3, %v111_v42, %v127_v49  ;;  %v122_v54 = vsel %vm118_vm1, %v102_v48, %v105_v40  ;;  %v124_v55 = vsel %vm120_vm3, %v108_v41, %v123_v45  ;;  %v1040_v40 = vld [vmem:[#allocation4 + $0x10] ss:$8 sps:$4 sm:$0xff]   ;;  %v1041_v42 = vld [vmem:[#allocation4 + $0x24] ss:$8 sps:$4 sm:$0xff]  }
  0xce   :  { %v132_v52 = vsel %vm120_vm3, %v114_v43, %v131_v50  ;;  %v129_v56 = vsel %vm119_vm4, %v126_v46, %v128_v51  ;;  %v125_v62 = vsel %vm119_vm4, %v122_v54, %v124_v55  ;;  %v1043_v48 = vld [vmem:[#allocation4 + $0x20] ss:$8 sps:$4 sm:$0xff]   ;;  %v1044_v51 = vld [vmem:[#allocation4 + $0x34] ss:$8 sps:$4 sm:$0xff]   ;;  %v1046_v54 = vld [vmem:[#allocation4 + $0x30] ss:$8 sps:$4 sm:$0xff]  }
  0xcf   :  { %v133_v57 = vsel %vm119_vm4, %v130_v47, %v132_v52  ;;  %v1338_v60 = vmul.u32.u64.low %v134_v53, %v129_v56  ;;  %v1339_v61 = vmul.u32.u64.high %v134_v53, %v129_v56, %v1338_v60  ;;  %v141_v0 = vmul.u32 %v134_v53, %v125_v62  ;;  %628 = vmatpush1.bf16.msra.mxu1 %v1040_v40  ;;  %v1047_v55 = vld [vmem:[#allocation4 + $0x44] ss:$8 sps:$4 sm:$0xff]   ;;  %v1049_v56 = vld [vmem:[#allocation4 + $0x40] ss:$8 sps:$4 sm:$0xff]  }
  0xd0   :  { %v1335_v58 = vmul.u32.u64.low %v134_v53, %v133_v57  ;;  %v1336_v59 = vmul.u32.u64.high %v134_v53, %v133_v57, %v1335_v58  ;;  %629 = vmatprep.subr.bf16.mxu1 %v1041_v42  ;;  %v1050_v57 = vld [vmem:[#allocation4 + $0x54] ss:$8 sps:$4 sm:$0xff]   ;;  %vm360_vm1 = vcmask 523264   ;;  %v1113_v40 = vld [vmem:[#allocation6 + $0xa0] ss:$8 sps:$4 sm:$0xff]  }
  0xd1   :  { %v144_v63 = vadd.s32 1, %v1339_v61  ;;  %v1052_v58 = vld [vmem:[#allocation4 + $0x50] ss:$8 sps:$4 sm:$0xff]   ;;  %v1121_v42 = vld [vmem:[#allocation6 + $0xc4] ss:$8 sps:$4 sm:$0xff]  }
  0xd2   :  { %vm143_vm5 = vc.u32 %v1336_v59, %v1338_v60  ;;  %v142_v13 = vadd.s32 %v1338_v60, %v1336_v59  ;;  %v1055_v59 = vld [vmem:[#allocation4 + $0x60] ss:$8 sps:$4 sm:$0xff]   ;;  %v1056_v60 = vld [vmem:[#allocation4 + $0x74] ss:$8 sps:$4 sm:$0xff]  }
  0xd3   :  { %v145_v1 = vsel %vm143_vm5, %v144_v63, %v1339_v61  ;;  %630 = vmatpush1.bf16.msra.mxu1 %v1043_v48  ;;  %v310_v48 = vlaneseq }
  0xd4   :  { %v146_v2 = vadd.s32 %v145_v1, %v141_v0  ;;  %631 = vmatprep.subr.bf16.mxu1 %v1044_v51  ;;  %v1058_v0 = vld [vmem:[#allocation4 + $0x70] ss:$8 sps:$4 sm:$0xff]   ;;  %v1059_v1 = vld [vmem:[#allocation4 + $0x84] ss:$8 sps:$4 sm:$0xff]   ;;  %v308_v51 = vld [vmem:[%s1368_s3] sm:$0x3] }
  0xd6   :  { %v147_v3 = vadd.s32 536870912, %v146_v2 }
  0xd7   :  { %632 = vmatpush1.bf16.msra.mxu1 %v1046_v54 }
  0xd8   :  { %v148_v4 = vshrl.u32 %v147_v3, 30  ;;  %633 = vmatprep.subr.bf16.mxu1 %v1047_v55  ;;  %v1062_v3 = vld [vmem:[#allocation4 + $0x94] ss:$8 sps:$4 sm:$0xff]  }
  0xda   :  { %v149_v5 = vshll.u32 %v148_v4, 30  ;;  %v172_v26 = vsub.s32 4, %v148_v4 }
  0xdb   :  { %634 = vmatpush1.bf16.msra.mxu1 %v1049_v56 }
  0xdc   :  { %v150_v6 = vsub.s32 %v146_v2, %v149_v5  ;;  %v173_v29 = vsel %vm88_vm7, %v172_v26, %v148_v4  ;;  %635 = vmatprep.subr.bf16.mxu1 %v1050_v57  ;;  %v1061_v2 = vld [vmem:[#allocation4 + $0x80] ss:$8 sps:$4 sm:$0xff]   ;;  %v1064_v4 = vld [vmem:[#allocation4 + $0x90] ss:$8 sps:$4 sm:$0xff]   ;;  %v1065_v5 = vld [vmem:[#allocation4 + $0xa4] ss:$8 sps:$4 sm:$0xff]  }
  0xdd   :  { %v175_v31 = vsel %vm87_vm8, 0, %v173_v29  ;;  %v1092_v26 = vld [vmem:[#allocation6 + $0x30] ss:$8 sps:$4 sm:$0xff]   ;;  %v1100_v29 = vld [vmem:[#allocation6 + $0x54] ss:$8 sps:$4 sm:$0xff]  }
  0xde   :  { %v152_v7 = vsub.s32 0, %v150_v6  ;;  %v179_v33 = vadd.s32 3, %v175_v31  ;;  %v283_v38 = vand.u32 3, %v175_v31  ;;  %v1103_v31 = vld [vmem:[#allocation6 + $0x64] ss:$8 sps:$4 sm:$0xff]  }
  0xdf   :  { %636 = vmatpush1.bf16.msra.mxu1 %v1052_v58 }
  0xe0   :  { %v923_v8 = vmin.u32 %v152_v7, %v150_v6  ;;  %v180_v37 = vand.u32 3, %v179_v33  ;;  %vm288_vm10 = vcmp.eq.s32.totalorder %v283_v38, 2  ;;  %vm285_vm12 = vcmp.eq.s32.totalorder %v283_v38, 0  ;;  %v1068_v7 = vld [vmem:[#allocation4 + $0xb4] ss:$8 sps:$4 sm:$0xff]  }
  0xe1   :  { %vm284_vm14 = vcmp.lt.s32.totalorder %v283_v38, 2  ;;  %v1106_v33 = vld [vmem:[#allocation6 + $0x74] ss:$8 sps:$4 sm:$0xff]   ;;  %v1110_v38 = vld [vmem:[#allocation6 + $0x90] ss:$8 sps:$4 sm:$0xff]  }
  0xe2   :  { %v154_v9 = vclz %v923_v8  ;;  %vm185_vm9 = vcmp.eq.s32.totalorder %v180_v37, 2  ;;  %vm182_vm11 = vcmp.eq.s32.totalorder %v180_v37, 0  ;;  %vm181_vm13 = vcmp.lt.s32.totalorder %v180_v37, 2  ;;  %v1070_v8 = vld [vmem:[#allocation4 + $0xb0] ss:$8 sps:$4 sm:$0xff]  }
  0xe3   :  { %v1112_v37 = vld [vmem:[#allocation6 + $0x94] ss:$8 sps:$4 sm:$0xff]  }
  0xe4   :  { %v924_v10 = vadd.s32 4294967294, %v154_v9  ;;  %v1071_v9 = vld [vmem:[#allocation4 + $0xc4] ss:$8 sps:$4 sm:$0xff]  }
  0xe6   :  { %vm925_vm6 = vcmp.lt.s32.totalorder %v924_v10, 0 }
  0xe7   :  { %v157_v11 = vsel %vm925_vm6, 0, %v924_v10  ;;  %v1073_v10 = vld [vmem:[#allocation4 + $0xc0] ss:$8 sps:$4 sm:$0xff]  }
  0xe8   :  { %v158_v14 = vsub.s32 32, %v157_v11  ;;  %v162_v15 = vsub.s32 4294967266, %v157_v11  ;;  %v159_v16 = vshll.u32 %v150_v6, %v157_v11  ;;  %v1067_v6 = vld [vmem:[#allocation4 + $0xa0] ss:$8 sps:$4 sm:$0xff]   ;;  %v1074_v11 = vld [vmem:[#allocation4 + $0xd4] ss:$8 sps:$4 sm:$0xff]  }
  0xea   :  { %v160_v18 = vshrl.u32 %v142_v13, %v158_v14  ;;  %v163_v19 = vadd.s32 127, %v162_v15  ;;  %v1076_v13 = vld [vmem:[#allocation4 + $0xd0] ss:$8 sps:$4 sm:$0xff]   ;;  %v1077_v14 = vld [vmem:[#allocation4 + $0xe4] ss:$8 sps:$4 sm:$0xff]  }
  0xeb   :  { %v1079_v15 = vld [vmem:[#allocation4 + $0xe0] ss:$8 sps:$4 sm:$0xff]  }
  0xec   :  { %v161_v20 = vor.u32 %v160_v18, %v159_v16  ;;  %v164_v21 = vshll.u32 %v163_v19, 23  ;;  %v1080_v16 = vld [vmem:[#allocation4 + $0xf4] ss:$8 sps:$4 sm:$0xff]   ;;  %v1082_v18 = vld [vmem:[#allocation4 + $0xf0] ss:$8 sps:$4 sm:$0xff]  }
  0xed   :  { %v1083_v19 = vld [vmem:[#allocation6] ss:$8 sps:$4 sm:$0xff]  }
  0xee   :  { %v165_v22 = vor.u32 4788187, %v164_v21  ;;  %v168_v24 = vcvt.s32.f32 %v161_v20  ;;  %v1085_v20 = vld [vmem:[#allocation6 + $0x4] ss:$8 sps:$4 sm:$0xff]   ;;  %v1088_v21 = vld [vmem:[#allocation6 + $0x14] ss:$8 sps:$4 sm:$0xff]  }
  0xef   :  { %872 = vmatprep.subr.bf16.mxu0 %v1085_v20 }
  0xf0   :  { %v166_v23 = vand.u32 2147483647, %v165_v22  ;;  %v1086_v22 = vld [vmem:[#allocation6 + $0x10] ss:$8 sps:$4 sm:$0xff]  }
  0xf2   :  { %v169_v25 = vmul.f32 %v168_v24, %v166_v23  ;;  %v1091_v23 = vld [vmem:[#allocation6 + $0x24] ss:$8 sps:$4 sm:$0xff]   ;;  %v1089_v24 = vld [vmem:[#allocation6 + $0x20] ss:$8 sps:$4 sm:$0xff]  }
  0xf4   :  { %v170_v27 = vxor.u32 2147483648, %v169_v25 }
  0xf6   :  { %v171_v28 = vsel %vm88_vm7, %v170_v27, %v169_v25  ;;  %v1094_v25 = vld [vmem:[#allocation6 + $0x34] ss:$8 sps:$4 sm:$0xff]   ;;  %v1097_v27 = vld [vmem:[#allocation6 + $0x44] ss:$8 sps:$4 sm:$0xff]  }
  0xf7   :  { %v174_v30 = vsel %vm87_vm8, %v1329_v12, %v171_v28  ;;  %v1053_v12 = vld [vmem:[#allocation4 + $0x64] ss:$8 sps:$4 sm:$0xff]   ;;  %v1095_v28 = vld [vmem:[#allocation6 + $0x40] ss:$8 sps:$4 sm:$0xff]  }
  0xf8   :  { %1131 = vcosq.f32 %v174_v30  ;;  %637 = vmatprep.subr.bf16.mxu1 %v1053_v12 }
  0xf9   :  { %1133 = vsinq.f32 %v174_v30  ;;  %638 = vmatpush1.bf16.msra.mxu1 %v1055_v59  ;;  %v1098_v30 = vld [vmem:[#allocation6 + $0x50] ss:$8 sps:$4 sm:$0xff]  }
  0xfa   :  { %639 = vmatprep.subr.bf16.mxu1 %v1056_v60 }
  0xfd   :  { %640 = vmatpush1.bf16.msra.mxu1 %v1058_v0 }
  0xfe   :  { %641 = vmatprep.subr.bf16.mxu1 %v1059_v1 }
 0x101   :  { %642 = vmatpush1.bf16.msra.mxu1 %v1061_v2 }
 0x102   :  { %v1132_v39 = vpop.eup %1131  ;;  %643 = vmatprep.subr.bf16.mxu1 %v1062_v3 }
 0x103   :  { %v1134_v41 = vpop.eup %1133  ;;  %v186_v17 = vxor.u32 2147483648, %v1132_v39 }
 0x104   :  { %v183_v43 = vxor.u32 2147483648, %v1134_v41 }
 0x105   :  { %v290_v44 = vsel %vm288_vm10, %v186_v17, %v1134_v41  ;;  %v187_v45 = vsel %vm185_vm9, %v186_v17, %v1134_v41  ;;  %644 = vmatpush1.bf16.msra.mxu1 %v1064_v4  ;;  %v1118_v41 = vld [vmem:[#allocation6 + $0xb4] ss:$8 sps:$4 sm:$0xff]   ;;  %v1116_v17 = vld [vmem:[#allocation6 + $0xb0] ss:$8 sps:$4 sm:$0xff]  }
 0x106   :  { %v287_v46 = vsel %vm285_vm12, %v1132_v39, %v183_v43  ;;  %v184_v47 = vsel %vm182_vm11, %v1132_v39, %v183_v43  ;;  %645 = vmatprep.subr.bf16.mxu1 %v1065_v5  ;;  %v1115_v39 = vld [vmem:[#allocation6 + $0xa4] ss:$8 sps:$4 sm:$0xff]   ;;  %v1119_v43 = vld [vmem:[#allocation6 + $0xc0] ss:$8 sps:$4 sm:$0xff]  }
 0x107   :  { %v291_v49 = vsel %vm284_vm14, %v287_v46, %v290_v44  ;;  %v188_v50 = vsel %vm181_vm13, %v184_v47, %v187_v45  ;;  %v1124_v44 = vld [vmem:[#allocation6 + $0xd4] ss:$8 sps:$4 sm:$0xff]   ;;  %v1122_v45 = vld [vmem:[#allocation6 + $0xd0] ss:$8 sps:$4 sm:$0xff]   ;;  %v1127_v46 = vld [vmem:[#allocation6 + $0xe4] ss:$8 sps:$4 sm:$0xff]  }
 0x108   :  { %v292_v52 = vsel %vm178_vm15, nan, %v291_v49  ;;  %v189_v53 = vsel %vm178_vm15, nan, %v188_v50  ;;  %v1125_v47 = vld [vmem:[#allocation6 + $0xe0] ss:$8 sps:$4 sm:$0xff]   ;;  %v311_v49 = vshrl.u32 %v310_v48, 7 }
 0x109   :  { %294 = vrot.lane.b32.xlu0 %v292_v52, %s1225_s0  ;;  %646 = vmatpush1.bf16.msra.mxu1 %v1067_v6 }
 0x10a   :  { %647 = vmatprep.subr.bf16.mxu1 %v1068_v7  ;;  %v312_v50 = vsub.s32 0, %v311_v49  ;;  %v316_v52 = vsub.s32 1, %v311_v49 }
 0x10c   :  { %v317_v54 = vrot.slane %v308_v51, %v316_v52 }
 0x10d   :  { %648 = vmatpush1.bf16.msra.mxu1 %v1070_v8  ;;  %v1130_v8 = vld [vmem:[#allocation6 + $0xf4] ss:$8 sps:$4 sm:$0xff]  }
 0x10e   :  { %649 = vmatprep.subr.bf16.mxu1 %v1071_v9  ;;  %v1128_v9 = vld [vmem:[#allocation6 + $0xf0] ss:$8 sps:$4 sm:$0xff]  }
 0x111   :  { %650 = vmatpush1.bf16.msra.mxu1 %v1073_v10  ;;  %v453_v10 = vld [vmem:[%s1370_s5] sm:$0x3] }
 0x112   :  { %651 = vmatprep.subr.bf16.mxu1 %v1074_v11  ;;  %v458_v11 = vrot.slane %v453_v10, %v312_v50 }
 0x115   :  { %652 = vmatpush1.bf16.msra.mxu1 %v1076_v13  ;;  %v462_v13 = vrot.slane %v453_v10, %v316_v52 }
 0x116   :  { %653 = vmatprep.subr.bf16.mxu1 %v1077_v14 }
 0x119   :  { %654 = vmatpush1.bf16.msra.mxu1 %v1079_v15 }
 0x11a   :  { %655 = vmatprep.subr.bf16.mxu1 %v1080_v16 }
 0x11d   :  { %656 = vmatpush1.bf16.msra.mxu1 %v1082_v18 }
 0x17b   :  { %v295_v61 = vpop.permute.xlu0 %294 }
 0x17c   :  { %v298_v62 = vsel %vm297_vm0, %v189_v53, %v295_v61  ;;  %v313_v53 = vrot.slane %v308_v51, %v312_v50 }
 0x17d   :  { %v299_v63 = vpack.c.bf16 %v298_v62, %v298_v62 }
 0x17f   :  { %938 = vmatmul.mubr.msk.bf16.vlgmr.msra.gmra.mrb[0].mxu0 %vm360_vm1, %v299_v63 }
 0x180   :  { %873 = vmatpush1.bf16.msra.mxu0 %v1083_v19 }
 0x181   :  { %874 = vmatprep.subr.bf16.mxu0 %v1088_v21 }
 0x184   :  { %875 = vmatpush1.bf16.msra.mxu0 %v1086_v22 }
 0x185   :  { %876 = vmatprep.subr.bf16.mxu0 %v1091_v23  ;;  %v700_v23 = vld [vmem:[%s1372_s7] sm:$0x3] }
 0x188   :  { %877 = vmatpush1.bf16.msra.mxu0 %v1089_v24  ;;  %v705_v24 = vrot.slane %v700_v23, %v312_v50 }
 0x189   :  { %878 = vmatprep.subr.bf16.mxu0 %v1094_v25  ;;  %v709_v25 = vrot.slane %v700_v23, %v316_v52 }
 0x18c   :  { %879 = vmatpush1.bf16.msra.mxu0 %v1092_v26 }
 0x18d   :  { %880 = vmatprep.subr.bf16.mxu0 %v1097_v27 }
 0x190   :  { %881 = vmatpush1.bf16.msra.mxu0 %v1095_v28 }
 0x191   :  { %882 = vmatprep.subr.bf16.mxu0 %v1100_v29 }
 0x194   :  { %883 = vmatpush1.bf16.msra.mxu0 %v1098_v30 }
 0x195   :  { %884 = vmatprep.subr.bf16.mxu0 %v1103_v31 }
 0x198   :  { %885 = vmatpush1.bf16.msra.mxu0 %v1101_v32 }
 0x199   :  { %886 = vmatprep.subr.bf16.mxu0 %v1106_v33 }
 0x19c   :  { %887 = vmatpush1.bf16.msra.mxu0 %v1104_v34 }
 0x19d   :  { %888 = vmatprep.subr.bf16.mxu0 %v1109_v35 }
 0x1a0   :  { %889 = vmatpush1.bf16.msra.mxu0 %v1107_v36 }
 0x1a1   :  { %890 = vmatprep.subr.bf16.mxu0 %v1112_v37 }
 0x1a4   :  { %891 = vmatpush1.bf16.msra.mxu0 %v1110_v38 }
 0x1a5   :  { %892 = vmatprep.subr.bf16.mxu0 %v1115_v39 }
 0x1a8   :  { %893 = vmatpush1.bf16.msra.mxu0 %v1113_v40 }
 0x1a9   :  { %894 = vmatprep.subr.bf16.mxu0 %v1118_v41 }
 0x1ac   :  { %895 = vmatpush1.bf16.msra.mxu0 %v1116_v17 }
 0x1ad   :  { %896 = vmatprep.subr.bf16.mxu0 %v1121_v42 }
 0x1b0   :  { %897 = vmatpush1.bf16.msra.mxu0 %v1119_v43 }
 0x1b1   :  { %898 = vmatprep.subr.bf16.mxu0 %v1124_v44 }
 0x1b4   :  { %899 = vmatpush1.bf16.msra.mxu0 %v1122_v45 }
 0x1b5   :  { %900 = vmatprep.subr.bf16.mxu0 %v1127_v46 }
 0x1b8   :  { %901 = vmatpush1.bf16.msra.mxu0 %v1125_v47 }
 0x1b9   :  { %902 = vmatprep.subr.bf16.mxu0 %v1130_v8 }
 0x1bc   :  { %903 = vmatpush1.bf16.msra.mxu0 %v1128_v9 }
 0x252   :  { %v398_v55 = vpop.f32.mrb[0].mxu0 }
 0x253   :  { %v399_v56 = vadd.f32 %v398_v55, %v313_v53  ;;  %v400_v57 = vpop.f32.mrb[1].mxu0 }
 0x254   :  { %v401_v58 = vadd.f32 %v400_v57, %v317_v54  ;;  %v402_v12 = vpop.f32.mrb[2].mxu0 }
 0x255   :  { %v939_v59 = vmul.f32 -1.442695, %v399_v56  ;;  %v403_v60 = vpop.f32.mrb[3].mxu0 }
 0x256   :  { %v940_v61 = vmul.f32 -1.442695, %v401_v58 }
 0x257   :  { %1135 = vpow2.f32 %v939_v59 }
 0x258   :  { %1137 = vpow2.f32 %v940_v61 }
 0x261   :  { %v1136_v62 = vpop.eup %1135 }
 0x262   :  { %v1138_v63 = vpop.eup %1137  ;;  %v411_v0 = vadd.f32 1.0, %v1136_v62 }
 0x263   :  { %v412_v1 = vadd.f32 1.0, %v1138_v63 }
 0x264   :  { %1139 = vrcp.f32 %v411_v0 }
 0x265   :  { %1141 = vrcp.f32 %v412_v1 }
 0x26e   :  { %v1140_v2 = vpop.eup %1139 }
 0x26f   :  { %v1142_v3 = vpop.eup %1141  ;;  %v417_v4 = vmul.f32 %v1140_v2, %v399_v56 }
 0x270   :  { %v418_v5 = vmul.f32 %v1142_v3, %v401_v58 }
 0x271   :  { %v419_v7 = vpack.c.bf16 %v417_v4, %v417_v4 }
 0x272   :  { %v420_v6 = vpack.c.bf16 %v418_v5, %v418_v5 }
 0x274   :  { %657 = vmatprep.mubr.bf16.mxu1 %v420_v6 }
 0x275   :  { %658 = vmatmul.mubr.bf16.vlgmr.msra.gmra.mrb[0].mxu1 %v419_v7 }
 0x348   :  { %v659_v14 = vpop.f32.mrb[0].mxu1 }
 0x349   :  { %v660_v15 = vadd.f32 %v659_v14, %v458_v11  ;;  %v661_v16 = vpop.f32.mrb[1].mxu1 }
 0x34a   :  { %v662_v18 = vadd.f32 %v661_v16, %v462_v13  ;;  %v663_v19 = vpop.f32.mrb[2].mxu1 }
 0x34b   :  { %v664_v20 = vpop.f32.mrb[3].mxu1  ;;  %v666_v22 = vpack.c.bf16 %v660_v15, %v660_v15 }
 0x34c   :  { %v667_v21 = vpack.c.bf16 %v662_v18, %v662_v18 }
 0x34e   :  { %904 = vmatprep.mubr.bf16.mxu0 %v667_v21 }
 0x34f   :  { %905 = vmatmul.mubr.bf16.vlgmr.msra.gmra.mrb[4].mxu0 %v666_v22 }
 0x422   :  { %v906_v26 = vpop.f32.mrb[4].mxu0 }
 0x423   :  { %v907_v27 = vadd.f32 %v906_v26, %v705_v24  ;;  %v908_v28 = vpop.f32.mrb[5].mxu0 }
 0x424   :  { %v909_v29 = vadd.f32 %v908_v28, %v709_v25  ;;  %v910_v30 = vpop.f32.mrb[6].mxu0 }
 0x425   :  { %913 = vst [vmem:[%s1373_s8] sm:$0xff] %v907_v27  ;;  %v911_v31 = vpop.f32.mrb[7].mxu0 }
 0x426   :  { %914 = vst [vmem:[%s1373_s8 + $0x8] sm:$0xff] %v909_v29 }
 0x427   :  { %919 = vsyncpa [#allocation3], 1 }
 0x428   :  { %920 = vsyncpa [#allocation5], 1 }

</bundles_post_ra>
